<compile_context>
chip_gen: v7x
topology: tpu7x:2x2x1
jax: 0.10.0
libtpu: 0.0.40
codegen_flags: <defaults>
</compile_context>

<pallas_src>
import math
import jax
import jax.numpy as jnp
from jax import lax
from jax.experimental import pallas as pl
from jax.experimental.pallas import tpu as pltpu


def _prune_linear_kernel(x_ref, w_ref, mask_ref, b_ref, o_ref, acc_ref):
    k = pl.program_id(2)

    @pl.when(k == 0)
    def _():
        acc_ref[...] = jnp.zeros_like(acc_ref)

    # Apply pruning mask to this weight tile (VPU), then MXU matmul
    # contracting the shared last (K) dim -- no in-kernel transpose.
    w_eff = w_ref[...] * mask_ref[...]                       # (tn, tk)
    acc_ref[...] += lax.dot_general(
        x_ref[...], w_eff,
        dimension_numbers=(((1,), (1,)), ((), ())),          # x[.,K] . w[.,K]
        preferred_element_type=jnp.float32)                  # (tm, tn)

    @pl.when(k == pl.num_programs(2) - 1)
    def _():
        out = acc_ref[...] + b_ref[...].astype(jnp.float32)  # bias add once
        o_ref[...] = out.astype(o_ref.dtype)                 # single store


def _round_up(v, m):
    return ((v + m - 1) // m) * m


def prune_linear_forward(x, weight, mask, bias, *, tm=256, tn=512, tk=512):
    """x: (B, in), weight/mask: (out, in), bias: (out,) -> (B, out)."""
    B, K = x.shape
    N, _ = weight.shape
    out_dtype = x.dtype

    # Clamp tile sizes to the (8,128)-aligned problem size.
    tm = min(tm, _round_up(B, 8))
    tn = min(tn, _round_up(N, 128))
    tk = min(tk, _round_up(K, 128))

    # Pad every dim up to a tile multiple (zero padding contributes nothing
    # to the accumulation; extra output rows/cols are sliced off below).
    Mp, Np, Kp = _round_up(B, tm), _round_up(N, tn), _round_up(K, tk)
    xp = jnp.pad(x, ((0, Mp - B), (0, Kp - K)))
    wp = jnp.pad(weight, ((0, Np - N), (0, Kp - K)))
    mp = jnp.pad(mask, ((0, Np - N), (0, Kp - K)))
    bp = jnp.pad(bias, (0, Np - N)).reshape(1, Np)

    grid = (Mp // tm, Np // tn, Kp // tk)

    out_padded = pl.pallas_call(
        _prune_linear_kernel,
        out_shape=jax.ShapeDtypeStruct((Mp, Np), out_dtype),
        grid_spec=pltpu.PrefetchScalarGridSpec(
            num_scalar_prefetch=0,
            grid=grid,
            in_specs=[
                pl.BlockSpec((tm, tk), lambda i, j, k: (i, k)),   # x
                pl.BlockSpec((tn, tk), lambda i, j, k: (j, k)),   # weight
                pl.BlockSpec((tn, tk), lambda i, j, k: (j, k)),   # mask
                pl.BlockSpec((1, tn), lambda i, j, k: (0, j)),    # bias
            ],
            out_specs=pl.BlockSpec((tm, tn), lambda i, j, k: (i, j)),
            scratch_shapes=[pltpu.VMEM((tm, tn), jnp.float32)],
        ),
        compiler_params=pltpu.CompilerParams(
            dimension_semantics=("parallel", "parallel", "arbitrary")),
    )(xp, wp, mp, bp)

    return out_padded[:B, :N]


if __name__ == "__main__":
    # Small shapes consistent with nn.Linear(in_features, out_features),
    # deliberately ragged so the padding + multi-tile (grid (2,2,3)) path
    # with K-accumulation is exercised.
    batch = 10
    in_features = 300
    out_features = 200

    key = jax.random.PRNGKey(0)
    kx, kw, kb = jax.random.split(key, 3)

    # Deterministic parameter init matching the module's __init__:
    #   weight ~ N(0, sqrt(2 / (m + n)))
    #   bias   ~ U(-1/sqrt(in), 1/sqrt(in))  (nn.Linear default, untouched)
    std = math.sqrt(2.0 / (in_features + out_features))
    weight = std * jax.random.normal(kw, (out_features, in_features),
                                     dtype=jnp.float32)
    bound = 1.0 / math.sqrt(in_features)
    bias = jax.random.uniform(kb, (out_features,), dtype=jnp.float32,
                              minval=-bound, maxval=bound)

    # Emulate a pruned mask (e.g. after prune_by_std) so the mask path is
    # actually exercised; freshly-initialized module would use all-ones.
    mask = (jnp.abs(weight) > 0.25 * std).astype(jnp.float32)

    x = jax.random.normal(kx, (batch, in_features), dtype=jnp.float32)

    # Small tiles so the demo shapes produce a real multi-tile grid.
    out = prune_linear_forward(x, weight, mask, bias, tm=8, tn=128, tk=128)
    out = jax.block_until_ready(out)

    # Pure-JAX reference check (masked linear).
    ref = jnp.einsum("bk,nk->bn", x, weight * mask,
                     precision=lax.Precision.HIGHEST) + bias
    assert out.shape == (batch, out_features)
    assert jnp.allclose(out, ref, atol=1e-3, rtol=1e-3)

    print("KERNEL_OK")
</pallas_src>

<mosaic_0001>
module attributes {stable_mosaic.version = 11 : i64} {
  func.func @_prune_linear_kernel(%arg0: i32, %arg1: i32, %arg2: i32, %arg3: memref<8x128xf32, #tpu.memory_space<vmem>>, %arg4: memref<128x128xf32, #tpu.memory_space<vmem>>, %arg5: memref<128x128xf32, #tpu.memory_space<vmem>>, %arg6: memref<1x128xf32, #tpu.memory_space<vmem>>, %arg7: memref<8x128xf32, #tpu.memory_space<vmem>>, %arg8: memref<8x128xf32, #tpu.memory_space<vmem>>) attributes {dimension_semantics = [#tpu.dimension_semantics<parallel>, #tpu.dimension_semantics<parallel>, #tpu.dimension_semantics<arbitrary>], iteration_bounds = array<i64: 2, 2, 3>, scalar_prefetch = 0 : i64, scratch_operands = 1 : i64, tpu.core_type = #tpu.core_type<tc>, window_params = [{transform_indices = @transform_0, window_bounds = array<i64: 8, 128>}, {transform_indices = @transform_1, window_bounds = array<i64: 128, 128>}, {transform_indices = @transform_2, window_bounds = array<i64: 128, 128>}, {transform_indices = @transform_3, window_bounds = array<i64: 1, 128>}, {transform_indices = @transform_4, window_bounds = array<i64: 8, 128>}]} {
    %c0_i32 = arith.constant 0 : i32
    %0 = arith.cmpi eq, %arg2, %c0_i32 : i32
    %1 = arith.extui %0 : i1 to i32
    %c0_i32_0 = arith.constant 0 : i32
    %2 = arith.cmpi ne, %1, %c0_i32_0 : i32
    scf.if %2 {
      %cst_11 = arith.constant 0.000000e+00 : f32
      %14 = vector.broadcast %cst_11 : f32 to vector<8x128xf32>
      %c0_12 = arith.constant 0 : index
      %c0_13 = arith.constant 0 : index
      %15 = vector.load %arg8[%c0_12, %c0_13] : memref<8x128xf32, #tpu.memory_space<vmem>>, vector<8x128xf32>
      tpu.vector_store %arg8[%c0_12, %c0_13], %14 {strides = array<i32>} : memref<8x128xf32, #tpu.memory_space<vmem>>, vector<8x128xf32>,
    } else {
    }
    %c0 = arith.constant 0 : index
    %c0_1 = arith.constant 0 : index
    %3 = vector.load %arg4[%c0, %c0_1] : memref<128x128xf32, #tpu.memory_space<vmem>>, vector<128x128xf32>
    %c0_2 = arith.constant 0 : index
    %c0_3 = arith.constant 0 : index
    %4 = vector.load %arg5[%c0_2, %c0_3] : memref<128x128xf32, #tpu.memory_space<vmem>>, vector<128x128xf32>
    %5 = arith.mulf %3, %4 : vector<128x128xf32>
    %c0_4 = arith.constant 0 : index
    %c0_5 = arith.constant 0 : index
    %6 = vector.load %arg8[%c0_4, %c0_5] : memref<8x128xf32, #tpu.memory_space<vmem>>, vector<8x128xf32>
    %c0_6 = arith.constant 0 : index
    %c0_7 = arith.constant 0 : index
    %7 = vector.load %arg3[%c0_6, %c0_7] : memref<8x128xf32, #tpu.memory_space<vmem>>, vector<8x128xf32>
    %cst = arith.constant dense<0.000000e+00> : vector<8x128xf32>
    %8 = tpu.matmul %7, %5, %cst {dimension_numbers = #tpu.dot_dimension_numbers<[1], [1], [0], [0], [0, 0, 1, 0], [], []>} : vector<8x128xf32>, vector<128x128xf32>, vector<8x128xf32> -> vector<8x128xf32>
    %9 = arith.addf %6, %8 : vector<8x128xf32>
    %c0_8 = arith.constant 0 : index
    %c0_9 = arith.constant 0 : index
    %10 = vector.load %arg8[%c0_8, %c0_9] : memref<8x128xf32, #tpu.memory_space<vmem>>, vector<8x128xf32>
    tpu.vector_store %arg8[%c0_8, %c0_9], %9 {strides = array<i32>} : memref<8x128xf32, #tpu.memory_space<vmem>>, vector<8x128xf32>,
    %c2_i32 = arith.constant 2 : i32
    %11 = arith.cmpi eq, %arg2, %c2_i32 : i32
    %12 = arith.extui %11 : i1 to i32
    %c0_i32_10 = arith.constant 0 : i32
    %13 = arith.cmpi ne, %12, %c0_i32_10 : i32
    scf.if %13 {
      %c0_11 = arith.constant 0 : index
      %c0_12 = arith.constant 0 : index
      %14 = vector.load %arg8[%c0_11, %c0_12] : memref<8x128xf32, #tpu.memory_space<vmem>>, vector<8x128xf32>
      %c0_13 = arith.constant 0 : index
      %c0_14 = arith.constant 0 : index
      %15 = vector.load %arg6[%c0_13, %c0_14] : memref<1x128xf32, #tpu.memory_space<vmem>>, vector<1x128xf32>
      %16 = vector.broadcast %15 : vector<1x128xf32> to vector<8x128xf32>
      %17 = arith.addf %14, %16 : vector<8x128xf32>
      %c0_15 = arith.constant 0 : index
      %c0_16 = arith.constant 0 : index
      %18 = vector.load %arg7[%c0_15, %c0_16] : memref<8x128xf32, #tpu.memory_space<vmem>>, vector<8x128xf32>
      tpu.vector_store %arg7[%c0_15, %c0_16], %17 {strides = array<i32>} : memref<8x128xf32, #tpu.memory_space<vmem>>, vector<8x128xf32>,
    } else {
    }
    return
  }
  func.func @transform_0(%arg0: i32, %arg1: i32, %arg2: i32) -> (i32, i32) {
    %c0_i32 = arith.constant 0 : i32
    return %arg0, %arg2 : i32, i32
  }
  func.func @transform_1(%arg0: i32, %arg1: i32, %arg2: i32) -> (i32, i32) {
    %c0_i32 = arith.constant 0 : i32
    return %arg1, %arg2 : i32, i32
  }
  func.func @transform_2(%arg0: i32, %arg1: i32, %arg2: i32) -> (i32, i32) {
    %c0_i32 = arith.constant 0 : i32
    return %arg1, %arg2 : i32, i32
  }
  func.func @transform_3(%arg0: i32, %arg1: i32, %arg2: i32) -> (i32, i32) {
    %c0_i32 = arith.constant 0 : i32
    %c0_i32_0 = arith.constant 0 : i32
    return %c0_i32, %arg1 : i32, i32
  }
  func.func @transform_4(%arg0: i32, %arg1: i32, %arg2: i32) -> (i32, i32) {
    %c0_i32 = arith.constant 0 : i32
    return %arg0, %arg1 : i32, i32
  }
}

</mosaic_0001>

<bundles_post_ra>
// kernel: tpu_custom_call.1
= control target key start
LH: loop header
LB: loop body
LE: loop exit
PB: predicated region body
PF: predicated region fallthrough
CT: control target
= control target key end

     0   :  { %s1671_s0 = inlined_call_operand.hbm [shape: f32[16,384], index: 0, kind: input, shape index: {}]   ;;  %s1672_s1 = inlined_call_operand.hbm [shape: f32[256,384], index: 1, kind: input, shape index: {}]   ;;  %s1673_s2 = inlined_call_operand.hbm [shape: f32[256,384], index: 2, kind: input, shape index: {}]   ;;  %s1674_s3 = inlined_call_operand.vmem [shape: f32[1,256], index: 3, kind: input, shape index: {}]   ;;  %s1675_s4 = inlined_call_operand.hbm [shape: f32[16,256], index: 4, kind: output, shape index: {}]  }
   0x1   :  { %1696 = sst [smem:[#allocation26_spill]] %s1672_s1 }
   0x2   :  { %1697 = sst [smem:[#allocation27_spill]] %s1674_s3 }
   0x3   :  { %1698 = sst [smem:[#allocation28_spill]] %s1675_s4 }
   0x4   :  { %9 = vsyncpa [#allocation4], 0 }
   0x5   :  { %11 = vsyncpa [#allocation4 + $0x1], 0 }
   0x6   :  { %12 = vsyncpa [#allocation7], 0 }
   0x7   :  { %14 = vsyncpa [#allocation7 + $0x1], 0 }
   0x8   :  { %15 = vsyncpa [#allocation5], 0 }
   0x9   :  { %17 = vsyncpa [#allocation5 + $0x1], 0  ;;  %s1202_s15 = smov 0   ;;  %s1204_s16 = smov 0  }
   0xa   :  { %s1206_s17 = smov 0   ;;  %s1208_s18 = smov 0  }
   0xb   :  { %s1210_s19 = smov 0   ;;  %s1212_s20 = smov 0  }
   0xc   :  { %s1214_s21 = smov 0   ;;  %s1216_s22 = smov 0  }
   0xd   :  { %s1218_s23 = smov 0   ;;  %s1220_s24 = smov 0  }
   0xe   :  { %s1222_s25 = smov 0   ;;  %s1224_s26 = smov 0  }
   0xf   :  { %s1226_s27 = smov 0   ;;  %s1228_s28 = smov 0  }
  0x10   :  { %s1230_s29 = smov 0   ;;  %s1232_s30 = smov 0  }
  0x11 LB: > { %1699 = sst [smem:[#allocation13_spill]] %s1120_s19  ;;  %p59_p0 = scmp.eq.s32.totalorder %s1164_s30, 0  ;;  %s1164_s30 = sphi %s1232_s30, %s23_s30   ;;  %s1160_s29 = sphi %s1230_s29, %s1764_s29   ;;  %s1156_s28 = sphi %s1228_s28, %s1753_s28   ;;  %s1152_s27 = sphi %s1226_s27, %s1763_s27   ;;  %s1148_s26 = sphi %s1224_s26, %s1762_s26   ;;  %s1144_s25 = sphi %s1222_s25, %s1751_s25   ;;  %s1140_s24 = sphi %s1220_s24, %s1761_s24   ;;  %s1136_s23 = sphi %s1218_s23, %s1750_s23   ;;  %s1132_s22 = sphi %s1216_s22, %s1760_s22   ;;  %s1128_s21 = sphi %s1214_s21, %s1759_s21   ;;  %s1124_s20 = sphi %s1212_s20, %s1748_s20   ;;  %s1120_s19 = sphi %s1210_s19, %s1758_s19   ;;  %s1116_s18 = sphi %s1208_s18, %s1746_s18   ;;  %s1112_s17 = sphi %s1206_s17, %s1757_s17   ;;  %s1108_s16 = sphi %s1204_s16, %s1756_s16   ;;  %s1104_s15 = sphi %s1202_s15, %s1755_s15  }
  0x12   : > { %1700 = sst [smem:[#allocation14_spill]] %s1124_s20  ;;  %p86_p1 = scmp.ne.s32.totalorder %s1124_s20, %s1120_s19 }
  0x13   : > { %1701 = sst [smem:[#allocation15_spill]] %s1136_s23  ;;  %p1678_p2 = scmp.lt.s32.totalorder %s1164_s30, 12 }
  0x14   : > { %1702 = sst [smem:[#allocation16_spill]] %s1140_s24  ;;  %s218_s6 = sand.u32 1, %s1164_s30  }
  0x15   : > { %1703 = sst [smem:[#allocation17_spill]] %s1144_s25  ;;  %p88_p3 = por %p86_p1, %p59_p0 }
  0x16   : > { %1704 = sst [smem:[#allocation18_spill]] %s1148_s26  ;;  %s220_s7 = sand.u32 1, %s1124_s20  }
  0x17   : > { %1705 = sst [smem:[#allocation19_spill]] %s1156_s28  ;;  %s747_s8 = smul.u32 48, %s1156_s28 }
  0x18   : > { %s1292_s9 = sshll.u32 %s220_s7, 7  ;;  %p1296_p4 = pnand %p1678_p2, %p88_p3 }
  0x19   : > { %s1301_s11 = sadd.s32 %s1152_s27, %s747_s8  ;;  %s222_s13 = scalar_lea.vmem [#allocation6], %s1292_s9 }
  0x1a   : > { %s1677_s12 = sshll.u32 %s1301_s11, 7  ;;  %s231_s14 = sshll.u32 %s222_s13, 4  ;;  %s1312_s14 = int_to_ptr.vmem [resolvable:$true] %s231_s14 }
  0x1b   : > { %s1707_s1 = sld [smem:[#allocation26_spill]]  ;;  %s1314_s26 = scalar_lea.sflag [#allocation7], %s218_s6 }
  0x1c   : > { %p1692_p6 = pneg %p1296_p4 }
  0x21   : > { %s1310_s7 = scalar_lea.hbm %s1707_s1, %s1677_s12  ;;  %s913_s5 = scalar_lea.hbm %s1707_s1, 12288 }
  0x22   : > { %s908_s8 = scalar_lea.hbm %s1310_s7, 2048  ;;  %p914_p9 = scmp.lt.u32.totalorder %s1310_s7, %s1707_s1 }
  0x23   : > { %p909_p5 = scmp.ne.s32.totalorder %s1310_s7, %s908_s8  ;;  %p915_p10 = scmp.lt.u32.totalorder %s913_s5, %s908_s8 }
  0x24   : > { %p917_p12 = scmp.lt.u32.totalorder %s908_s8, %s1310_s7 }
  0x25   : > { %p911_p7 = pnand %p1692_p6, %p909_p5  ;;  %p916_p11 = por %p915_p10, %p914_p9 }
  0x27   : > { %p912_p8 = pneg %p911_p7  ;;  %p918_p13 = por %p917_p12, %p916_p11 }
  0x29   : > { %p919_p1 = pnand %p918_p13, %p912_p8 }
  0x2b   : > { %922 = shalt.err (!%p919_p1)
}
  0x2c   : > { %s923_s6 = scalar_lea.vmem %s1312_s14, 2048  ;;  %s1166_s13 = smov [#allocation6]  }
  0x2d   : > { %p924_p3 = scmp.ne.s32.totalorder %s1312_s14, %s923_s6  ;;  %s928_s4 = sshll.u32 %s1166_s13, 4  ;;  %s929_s4 = int_to_ptr.vmem [resolvable:$false] %s928_s4 }
  0x2e   : > { %s930_s24 = scalar_lea.vmem %s929_s4, 4096  ;;  %p931_p2 = scmp.lt.s32.totalorder %s1312_s14, %s929_s4 }
  0x2f   : > { %p926_p5 = pnand %p924_p3, %p1692_p6  ;;  %p932_p9 = scmp.lt.s32.totalorder %s930_s24, %s923_s6 }
  0x31   : > { %p927_p7 = pneg %p926_p5  ;;  %p933_p10 = por %p932_p9, %p931_p2 }
  0x33   : > { %p934_p11 = pnand %p933_p10, %p927_p7 }
  0x35   : > { %937 = shalt.err (!%p934_p11)
}
  0x36   : > { %s1679_s12 = smov 384   ;;  %s1680_s8 = smov 128  }
  0x37   : > { %s1681_s5 = smov 8   ;;  %s1708_s6 = sshll.u32 %s1301_s11, 7 }
  0x38   : > { %763 = dma.hbm_to_vmem [thread:$0]  (!%p1296_p4), %s1310_s7, 2048, %s1312_s14, %s1314_s26, %s1679_s12, %s1680_s8, %s1681_s5  }
  0x39   : > { %s1350_s24 = scalar_lea.hbm %s1673_s2, %s1708_s6  ;;  %s245_s1 = scalar_lea.vmem [#allocation8], %s1292_s9 }
  0x3a   : > { %s254_s3 = sshll.u32 %s245_s1, 4  ;;  %p657_p2 = scmp.ge.s32.totalorder %s1164_s30, 1  ;;  %s1354_s3 = int_to_ptr.vmem [resolvable:$true] %s254_s3 }
  0x3b   : > { %p268_p8 = scmp.lt.s32.totalorder %s1164_s30, 13  ;;  %s1362_s14 = sadd.s32 4294967295, %s1164_s30  }
  0x3c   : > { %s35_s9 = sadd.s32 1, %s1152_s27  ;;  %s38_s1 = sadd.s32 1, %s1156_s28 }
  0x3d   : > { %p1357_p12 = pnand %p657_p2, %p268_p8  ;;  %p36_p13 = scmp.ge.s32.totalorder %s35_s9, 3 }
  0x3e   : > { %s42_s6 = sadd.s32 1, %s1160_s29  ;;  %s51_s13 = sadd.s32 1, %s1136_s23 }
  0x3f   : > { %s1709_s11 = scalar_select %p1357_p12, 1, 0 }
  0x40   : > { %s1766_s9 = smov (%p36_p13, %s35_s9), 0  ;;  %s1768_s1 = smov (!%p36_p13, %s38_s1), %s1156_s28 }
  0x41   : > { %1710 = sst [smem:[#allocation20_spill]] %s1766_s9  ;;  %s47_s4 = ssub.s32 %s1152_s27, %s1766_s9 }
  0x42   : > { %p58_p1 = scmp.ne.s32.totalorder %s1136_s23, %s1132_s22  ;;  %p40_p3 = scmp.ge.s32.totalorder %s1768_s1, 2 }
  0x43   : > { %p64_p5 = scmp.ne.s32.totalorder %s1132_s22, %s1128_s21  ;;  %p65_p9 = scmp.eq.s32.totalorder %s1362_s14, 0 }
  0x44   : > { %p1380_p7 = por %p59_p0, %p58_p1  ;;  %s1770_s1 = smov (%p40_p3, %s1768_s1), 0 }
  0x45   : > { %1712 = sst [smem:[#allocation21_spill]] %s1770_s1  ;;  %s1772_s6 = smov (!%p40_p3, %s42_s6), %s1160_s29 }
  0x46   : > { %p1388_p10 = por %p65_p9, %p64_p5  ;;  %s74_s5 = ssub.s32 %s1156_s28, %s1770_s1 }
  0x47   : > { %p44_p11 = scmp.ge.s32.totalorder %s1772_s6, 2  ;;  %s76_s21 = sor.u32 %s74_s5, %s47_s4 }
  0x48   : > { %s1713_s8 = scalar_select %p1388_p10, 1, 0 }
  0x49   : > { %p77_p0 = scmp.eq.s32.totalorder %s76_s21, 0  ;;  %p92_p2 = scmp.ne.s32.totalorder %s1120_s19, %s1116_s18 }
  0x4a   : > { %1714 = sst [smem:[#allocation22_spill]] %s1713_s8  ;;  %s1774_s6 = smov (%p44_p11, %s1772_s6), 0 }
  0x4b   : > { %1715 = sst [smem:[#allocation23_spill]] %s1774_s6  ;;  %s1716_s7 = sadd.s32 1, %s1124_s20 }
  0x4c   : > { %s1401_s9 = scalar_select %p77_p0, %s1124_s20, %s1716_s7  }
  0x4d   : > { %s46_s25 = ssub.s32 %s1160_s29, %s1774_s6  ;;  %p1405_p8 = por %p92_p2, %p65_p9 }
  0x4e   : > { %1717 = sst [smem:[#allocation24_spill]] %s1401_s9  ;;  %s48_s1 = sor.u32 %s47_s4, %s46_s25 }
  0x4f   : > { %s1718_s8 = scalar_select %p1405_p8, 1, 0 }
  0x50   : > { %s158_s28 = sor.u32 %s74_s5, %s46_s25  ;;  %p49_p13 = scmp.eq.s32.totalorder %s48_s1, 0 }
  0x51   : > { %p159_p1 = scmp.eq.s32.totalorder %s158_s28, 0  ;;  %s161_s18 = sadd.s32 1, %s1112_s17 }
  0x52   : > { %p171_p3 = scmp.ne.s32.totalorder %s1112_s17, %s1108_s16  ;;  %p172_p5 = scmp.eq.s32.totalorder %s1362_s14, 11 }
  0x53   : > { %s1413_s21 = scalar_select %p49_p13, %s1136_s23, %s51_s13  }
  0x54   : > { %s1416_s19 = scalar_select %p159_p1, %s1112_s17, %s161_s18  }
  0x55   : > { %1719 = sst [smem:[#allocation25_spill]] %s1413_s21  ;;  %p177_p11 = scmp.ne.s32.totalorder %s1108_s16, %s1104_s15 }
  0x56   : > { %s1720_s7 = sadd.s32 4294967294, %s1164_s30   ;;  %s198_s6 = sand.u32 1, %s1136_s23  }
  0x57   : > { %p178_p9 = scmp.eq.s32.totalorder %s1720_s7, 11  ;;  %p1424_p0 = por %p172_p5, %p171_p3 }
  0x58   : > { %s647_s28 = sshll.u32 %s198_s6, 3  ;;  %s746_s5 = smul.u32 3, %s1160_s29 }
  0x59   : > { %s1721_s9 = scalar_select %p1424_p0, 1, 0 }
  0x5a   : > { %p1428_p2 = por %p178_p9, %p177_p11  ;;  %s202_s1 = scalar_lea.vmem [#allocation3], %s647_s28 }
  0x5b   : > { %s211_s13 = sshll.u32 %s202_s1, 4  ;;  %p1723_p13 = scmp.lt.s32.totalorder %s1164_s30, 12  ;;  %s1442_s13 = int_to_ptr.vmem [resolvable:$true] %s211_s13 }
  0x5c   : > { %s1722_s25 = scalar_select %p1428_p2, 1, 0 }
  0x5d   : > { %p1437_p1 = pnand %p1723_p13, %p1380_p7  ;;  %s207_s18 = sadd.s32 %s1152_s27, %s746_s5 }
  0x5e   : > { %s648_s7 = sshll.u32 %s207_s18, 7  ;;  %s199_s12 = scalar_lea.sflag [#allocation4], %s198_s6 }
  0x5f   : > { %s1447_s20 = scalar_lea.hbm %s1671_s0, %s648_s7  ;;  %p940_p3 = pneg %p1437_p1 }
  0x60   : > { %s938_s28 = scalar_lea.hbm %s1447_s20, 128  ;;  %s943_s18 = scalar_lea.hbm %s1671_s0, 768 }
  0x61   : > { %p939_p7 = scmp.ne.s32.totalorder %s1447_s20, %s938_s28  ;;  %p944_p9 = scmp.lt.u32.totalorder %s1447_s20, %s1671_s0 }
  0x62   : > { %p945_p13 = scmp.lt.u32.totalorder %s943_s18, %s938_s28  ;;  %p947_p2 = scmp.lt.u32.totalorder %s938_s28, %s1447_s20 }
  0x63   : > { %p941_p5 = pnand %p940_p3, %p939_p7 }
  0x64   : > { %p946_p6 = por %p945_p13, %p944_p9 }
  0x65   : > { %p942_p11 = pneg %p941_p5 }
  0x66   : > { %p948_p0 = por %p947_p2, %p946_p6 }
  0x68   : > { %p949_p8 = pnand %p948_p0, %p942_p11 }
  0x6a   : > { %952 = shalt.err (!%p949_p8)
}
  0x6b   : > { %s953_s6 = scalar_lea.vmem %s1442_s13, 128  ;;  %s1170_s7 = smov [#allocation3]  }
  0x6c   : > { %p954_p7 = scmp.ne.s32.totalorder %s1442_s13, %s953_s6  ;;  %s958_s5 = sshll.u32 %s1170_s7, 4  ;;  %s959_s5 = int_to_ptr.vmem [resolvable:$false] %s958_s5 }
  0x6d   : > { %s960_s1 = scalar_lea.vmem %s959_s5, 256  ;;  %p961_p12 = scmp.lt.s32.totalorder %s1442_s13, %s959_s5 }
  0x6e   : > { %p956_p5 = pnand %p954_p7, %p940_p3  ;;  %p962_p9 = scmp.lt.s32.totalorder %s960_s1, %s953_s6 }
  0x70   : > { %p957_p10 = pneg %p956_p5  ;;  %p963_p13 = por %p962_p9, %p961_p12 }
  0x72   : > { %p964_p6 = pnand %p963_p13, %p957_p10 }
  0x74   : > { %967 = shalt.err (!%p964_p6)
}
  0x75   : > { %760 = dma.hbm_to_vmem [thread:$0]  (!%p1437_p1), %s1447_s20, 128, %s1442_s13, %s199_s12  }
  0x76   : > { %s968_s28 = scalar_lea.hbm %s1350_s24, 2048  ;;  %p1725_p0 = pneg %p1296_p4 }
  0x77   : > { %p969_p8 = scmp.ne.s32.totalorder %s1350_s24, %s968_s28  ;;  %s973_s21 = scalar_lea.hbm %s1673_s2, 12288 }
  0x78   : > { %p974_p12 = scmp.lt.u32.totalorder %s1350_s24, %s1673_s2  ;;  %p975_p10 = scmp.lt.u32.totalorder %s973_s21, %s968_s28 }
  0x79   : > { %p971_p2 = pnand %p969_p8, %p1725_p0  ;;  %p977_p7 = scmp.lt.u32.totalorder %s968_s28, %s1350_s24 }
  0x7a   : > { %p976_p11 = por %p975_p10, %p974_p12 }
  0x7b   : > { %p972_p3 = pneg %p971_p2 }
  0x7c   : > { %p978_p5 = por %p977_p7, %p976_p11 }
  0x7e   : > { %p979_p9 = pnand %p978_p5, %p972_p3 }
  0x80   : > { %982 = shalt.err (!%p979_p9)
}
  0x81   : > { %s983_s20 = scalar_lea.vmem %s1354_s3, 2048  ;;  %p1726_p13 = pmov %p1725_p0 }
  0x82   : > { %p984_p1 = scmp.ne.s32.totalorder %s1354_s3, %s983_s20  ;;  %s1171_s13 = smov [#allocation8]  }
  0x83   : > { %s988_s12 = sshll.u32 %s1171_s13, 4  ;;  %s989_s12 = int_to_ptr.vmem [resolvable:$false] %s988_s12 }
  0x84   : > { %p986_p6 = pnand %p984_p1, %p1726_p13  ;;  %s990_s7 = scalar_lea.vmem %s989_s12, 4096 }
  0x85   : > { %p991_p0 = scmp.lt.s32.totalorder %s1354_s3, %s989_s12  ;;  %p992_p2 = scmp.lt.s32.totalorder %s990_s7, %s983_s20 }
  0x86   : > { %p987_p8 = pneg %p986_p6 }
  0x87   : > { %p993_p12 = por %p992_p2, %p991_p0 }
  0x89   : > { %p994_p10 = pnand %p993_p12, %p987_p8 }
  0x8b   : > { %997 = shalt.err (!%p994_p10)
}
  0x8c   : > { %s1727_s5 = smov 8   ;;  %s1728_s1 = smov 128  }
  0x8d   : > { %s1729_s28 = smov 384   ;;  %p1730_p3 = scmp.ne.s32.totalorder %s1709_s11, 0 }
  0x8e   : > { %766 = dma.hbm_to_vmem [thread:$0]  (!%p1296_p4), %s1350_s24, 2048, %s1354_s3, %s1314_s26, %s1729_s28, %s1728_s1, %s1727_s5  }
  0x8f   : > { %272 = sbr.rel (%p1730_p3) target bundleno = 502 (0x1f6), region = 36  ;;  %s1731_s18 = sld [smem:[#allocation22_spill]] (!%p1730_p3) }
  0x90   : > { %s274_s23 = sand.u32 (!%p1730_p3), 1, %s1132_s22  }
  0x91   : > { %s1504_s21 = sshll.u32 (!%p1730_p3), %s274_s23, 3  ;;  %s275_s6 = scalar_lea.sflag (!%p1730_p3), [#allocation4], %s274_s23 }
  0x92   : > { %s278_s4 = scalar_lea.vmem (!%p1730_p3), [#allocation3], %s1504_s21 }
  0x95   : > { %p1732_p11 = scmp.ne.s32.totalorder (!%p1730_p3), %s1731_s18, 0 }
  0x97   : > { %1091 = dma.done.wait (%p1732_p11), %s275_s6, 128  }
  0x98   : > { %1093 = vsyncadd (%p1732_p11), %s275_s6, 4294967168  ;;  %s1733_s10 = sld [smem:[#allocation13_spill]]  ;;  %s283_s3 = sand.u32 1, %s1362_s14  }
  0x99   : > { %s284_s11 = scalar_lea.sflag [#allocation7], %s283_s3  ;;  %p1734_p4 = scmp.ne.s32.totalorder %s1718_s8, 0 }
  0x9e   : > { %s285_s26 = sand.u32 1, %s1733_s10  }
  0x9f   : > { %s659_s24 = sshll.u32 %s285_s26, 7 }
  0xa0   : > { %s1513_s20 = scalar_lea.vmem [#allocation6], %s659_s24 }
  0xa1   : > { %1095 = dma.done.wait (%p1734_p4), %s284_s11, 4096  }
  0xa2   : > { %1097 = vsyncadd (%p1734_p4), %s284_s11, 4294963200  ;;  %s1735_s13 = sld [smem:[#allocation17_spill]]  ;;  %s331_s12 = sand.u32 1, %s1108_s16  }
  0xa3   : > { %s1522_s7 = sshll.u32 %s331_s12, 3  ;;  %s1736_s1 = sld [smem:[#allocation27_spill]] }
  0xa4   : > { %s1532_s18 = scalar_lea.vmem [#allocation8], %s659_s24  ;;  %s333_s8 = scalar_lea.vmem [#allocation9], %s1522_s7 }
  0xa5   : > { %s1737_s23 = sld [smem:[#allocation16_spill]] }
  0xa8   : > { %p336_p7 = scmp.lt.s32.totalorder %s1735_s13, 1 }
  0xaa   : > { %s1776_s13 = smov (!%p336_p7, %s1735_s13), 1 }
  0xab   : > { %s338_s28 = scalar_lea.vmem %s1736_s1, %s1776_s13  ;;  %p662_p5 = scmp.ne.s32.totalorder %s1737_s23, 0 }
  0xac   : > { %v1172_v0 = vmov (!%p662_p5), 0.0  }
  0xad   : > { %342 = sbr.rel (%p662_p5) target bundleno = 180 (0xb4), region = 52  ;;  %343 = vst [vmem:[#allocation2] sm:$0xff] (!%p662_p5), %v1172_v0 }
  0xb4 PF: > { %v344_v1 = vld [vmem:[%s1513_s20] sm:$0xff]  ;;  %v345_v2 = vld [vmem:[%s1513_s20 + $0x8] sm:$0xff]  ;;  %v1173_v4 = vmov 0.0|0.0   ;;  %vm1174_vm0 = vmmov 0   ;;  %v1175_v7 = vmov 0.0   ;;  %v346_v9 = vld [vmem:[%s1513_s20 + $0x10] sm:$0xff] }
  0xb5   : > { %v360_v3 = vld [vmem:[%s1532_s18] sm:$0xff]  ;;  %722 = vmatprep.subr.bf16.mxu0 %v1173_v4  ;;  %v361_v5 = vld [vmem:[%s1532_s18 + $0x8] sm:$0xff]  ;;  %719 = vmatprep.mubr.msk.f32.mxu0 %vm1174_vm0, %v1175_v7  ;;  %v347_v10 = vld [vmem:[%s1513_s20 + $0x18] sm:$0xff]  ;;  %s1738_s6 = sld [smem:[#allocation16_spill]] }
  0xb6   : > { %v376_v6 = vmul.f32 %v360_v3, %v344_v1  ;;  %v377_v8 = vmul.f32 %v361_v5, %v345_v2  ;;  %v362_v11 = vld [vmem:[%s1532_s18 + $0x10] sm:$0xff]  ;;  %v363_v12 = vld [vmem:[%s1532_s18 + $0x18] sm:$0xff]  ;;  %v348_v17 = vld [vmem:[%s1513_s20 + $0x20] sm:$0xff] }
  0xb7   : > { %v378_v14 = vmul.f32 %v362_v11, %v346_v9  ;;  %v379_v15 = vmul.f32 %v363_v12, %v347_v10  ;;  %v349_v18 = vld [vmem:[%s1513_s20 + $0x28] sm:$0xff]  ;;  %v364_v19 = vld [vmem:[%s1532_s18 + $0x20] sm:$0xff]  ;;  %v350_v24 = vld [vmem:[%s1513_s20 + $0x30] sm:$0xff] }
  0xb8   : > { %v723_v13 = vpack.c.bf16 %v377_v8, %v376_v6  ;;  %v365_v20 = vld [vmem:[%s1532_s18 + $0x28] sm:$0xff]  ;;  %v380_v21 = vmul.f32 %v364_v19, %v348_v17  ;;  %v351_v25 = vld [vmem:[%s1513_s20 + $0x38] sm:$0xff]  ;;  %v366_v26 = vld [vmem:[%s1532_s18 + $0x30] sm:$0xff] }
  0xb9   : > { %v726_v16 = vpack.c.bf16 %v379_v15, %v378_v14  ;;  %v381_v22 = vmul.f32 %v365_v20, %v349_v18  ;;  %v367_v27 = vld [vmem:[%s1532_s18 + $0x38] sm:$0xff]  ;;  %v382_v28 = vmul.f32 %v366_v26, %v350_v24  ;;  %v352_v31 = vld [vmem:[%s1513_s20 + $0x40] sm:$0xff]  ;;  %v353_v32 = vld [vmem:[%s1513_s20 + $0x48] sm:$0xff] }
  0xba   : > { %724 = vmatpush3.bf16.xpose.msra.mxu0 %v723_v13  ;;  %v383_v29 = vmul.f32 %v367_v27, %v351_v25  ;;  %v368_v33 = vld [vmem:[%s1532_s18 + $0x40] sm:$0xff]  ;;  %v369_v34 = vld [vmem:[%s1532_s18 + $0x48] sm:$0xff]  ;;  %v354_v38 = vld [vmem:[%s1513_s20 + $0x50] sm:$0xff] }
  0xbb   : > { %725 = vmatprep.subr.bf16.mxu0 %v1173_v4  ;;  %v729_v23 = vpack.c.bf16 %v381_v22, %v380_v21  ;;  %v384_v35 = vmul.f32 %v368_v33, %v352_v31  ;;  %v385_v36 = vmul.f32 %v369_v34, %v353_v32  ;;  %v355_v39 = vld [vmem:[%s1513_s20 + $0x58] sm:$0xff]  ;;  %v370_v40 = vld [vmem:[%s1532_s18 + $0x50] sm:$0xff]  ;;  %v356_v45 = vld [vmem:[%s1513_s20 + $0x60] sm:$0xff]  ;;  %p663_p9 = scmp.ne.s32.totalorder %s1738_s6, 2 }
  0xbc   : > { %v732_v30 = vpack.c.bf16 %v383_v29, %v382_v28  ;;  %v371_v41 = vld [vmem:[%s1532_s18 + $0x58] sm:$0xff]  ;;  %v386_v42 = vmul.f32 %v370_v40, %v354_v38  ;;  %v357_v46 = vld [vmem:[%s1513_s20 + $0x68] sm:$0xff]  ;;  %v372_v47 = vld [vmem:[%s1532_s18 + $0x60] sm:$0xff] }
  0xbd   : > { %v735_v37 = vpack.c.bf16 %v385_v36, %v384_v35  ;;  %v387_v43 = vmul.f32 %v371_v41, %v355_v39  ;;  %v373_v48 = vld [vmem:[%s1532_s18 + $0x68] sm:$0xff]  ;;  %v388_v49 = vmul.f32 %v372_v47, %v356_v45  ;;  %v358_v52 = vld [vmem:[%s1513_s20 + $0x70] sm:$0xff]  ;;  %v359_v53 = vld [vmem:[%s1513_s20 + $0x78] sm:$0xff] }
  0xbe   : > { %v389_v50 = vmul.f32 %v373_v48, %v357_v46  ;;  %v374_v54 = vld [vmem:[%s1532_s18 + $0x70] sm:$0xff]  ;;  %v375_v55 = vld [vmem:[%s1532_s18 + $0x78] sm:$0xff]  ;;  %v392_v60 = vld [vmem:[#allocation2] sm:$0xff] }
  0xbf   : > { %v738_v44 = vpack.c.bf16 %v387_v43, %v386_v42  ;;  %v390_v56 = vmul.f32 %v374_v54, %v358_v52  ;;  %v391_v57 = vmul.f32 %v375_v55, %v359_v53  ;;  %v393_v59 = vld [vmem:[%s278_s4] sm:$0xff]  ;;  %v664_v1 = vld [vmem:[%s338_s28] ss:$0 sm:$0xff] (!%p663_p9) }
  0xc0   : > { %v741_v51 = vpack.c.bf16 %v389_v50, %v388_v49 }
  0xc1   : > { %v744_v58 = vpack.c.bf16 %v391_v57, %v390_v56 }
  0xc2   : > { %727 = vmatpush3.bf16.xpose.msra.mxu0 %v726_v16 }
  0xc3   : > { %728 = vmatprep.subr.bf16.mxu0 %v1173_v4 }
  0xca   : > { %730 = vmatpush3.bf16.xpose.msra.mxu0 %v729_v23 }
  0xcb   : > { %731 = vmatprep.subr.bf16.mxu0 %v1173_v4 }
  0xd2   : > { %733 = vmatpush3.bf16.xpose.msra.mxu0 %v732_v30 }
  0xd3   : > { %734 = vmatprep.subr.bf16.mxu0 %v1173_v4 }
  0xda   : > { %736 = vmatpush3.bf16.xpose.msra.mxu0 %v735_v37 }
  0xdb   : > { %737 = vmatprep.subr.bf16.mxu0 %v1173_v4 }
  0xe2   : > { %739 = vmatpush3.bf16.xpose.msra.mxu0 %v738_v44 }
  0xe3   : > { %740 = vmatprep.subr.bf16.mxu0 %v1173_v4 }
  0xea   : > { %742 = vmatpush3.bf16.xpose.msra.mxu0 %v741_v51 }
  0xeb   : > { %743 = vmatprep.subr.bf16.mxu0 %v1173_v4 }
  0xf2   : > { %745 = vmatpush3.bf16.xpose.msra.mxu0 %v744_v58 }
  0xf9   : > { %720 = vmatmul.mubr.f32.vlgmr.msra.gmra.mrb[0].mxu0 %v393_v59 }
 0x1c9   : > { %469 = sbr.rel (%p663_p9) target bundleno = 474 (0x1da), region = 56 }
 0x1cc   : > { %v460_v61 = vpop.f32.mrb[0].mxu0 }
 0x1cd   : > { %v464_v62 = vadd.f32 %v460_v61, %v392_v60  ;;  %v721_v63 = vpop.f32.mrb[1].mxu0 }
 0x1cf   : > { %465 = vst [vmem:[#allocation2] sm:$0xff] %v464_v62 }
 0x1d6   : > { %v470_v0 = vld [vmem:[#allocation2] sm:$0xff] }
 0x1d7   : > { %v478_v2 = vadd.f32 %v664_v1, %v470_v0 }
 0x1d9   : > { %479 = vst [vmem:[%s333_s8] sm:$0xff] %v478_v2 }
 0x1da PF: > { %s1740_s21 = sld [smem:[#allocation18_spill]]  ;;  %s1741_s4 = sld [smem:[#allocation17_spill]] }
 0x1db   : > { %s496_s20 = sshll.u32 %s333_s8, 4  ;;  %s1742_s1 = sld [smem:[#allocation28_spill]]  ;;  %s1590_s20 = int_to_ptr.vmem [resolvable:$true] %s496_s20 }
 0x1dc   : > { %s481_s18 = scalar_lea.sflag [#allocation5], %s331_s12  ;;  %s998_s23 = scalar_lea.vmem %s1590_s20, 128 }
 0x1dd   : > { %p999_p1 = scmp.ne.s32.totalorder %s1590_s20, %s998_s23  ;;  %p1743_p13 = scmp.ne.s32.totalorder %s1721_s9, 0 }
 0x1de   : > { %s1176_s6 = smov [#allocation9]  }
 0x1df   : > { %p1000_p6 = pnand %p999_p1, %p1743_p13  ;;  %s1002_s7 = sshll.u32 %s1176_s6, 4  ;;  %s1003_s7 = int_to_ptr.vmem [resolvable:$false] %s1002_s7 }
 0x1e0   : > { %s666_s24 = sshll.u32 %s1740_s21, 1  ;;  %s1004_s8 = scalar_lea.vmem %s1003_s7, 256 }
 0x1e1   : > { %s492_s11 = sadd.s32 %s1741_s4, %s666_s24  ;;  %p1001_p8 = pneg %p1000_p6 }
 0x1e2   : > { %s667_s14 = sshll.u32 %s492_s11, 7  ;;  %p1005_p0 = scmp.lt.s32.totalorder %s1590_s20, %s1003_s7 }
 0x1e3   : > { %s494_s28 = scalar_lea.hbm %s1742_s1, %s667_s14  ;;  %p1006_p2 = scmp.lt.s32.totalorder %s1004_s8, %s998_s23 }
 0x1e5   : > { %p1007_p12 = por %p1006_p2, %p1005_p0 }
 0x1e7   : > { %p1008_p10 = pnand %p1007_p12, %p1001_p8 }
 0x1e9   : > { %1011 = shalt.err (!%p1008_p10)
}
 0x1ea   : > { %s1012_s10 = scalar_lea.hbm %s494_s28, 128  ;;  %s1016_s26 = scalar_lea.hbm %s1742_s1, 512 }
 0x1eb   : > { %p1013_p3 = scmp.ne.s32.totalorder %s494_s28, %s1012_s10  ;;  %p1017_p7 = scmp.lt.u32.totalorder %s494_s28, %s1742_s1 }
 0x1ec   : > { %p1018_p5 = scmp.lt.u32.totalorder %s1016_s26, %s1012_s10  ;;  %p1020_p1 = scmp.lt.u32.totalorder %s1012_s10, %s494_s28 }
 0x1ed   : > { %p1014_p11 = pnand %p1013_p3, %p1743_p13 }
 0x1ee   : > { %p1019_p9 = por %p1018_p5, %p1017_p7 }
 0x1ef   : > { %p1015_p4 = pneg %p1014_p11 }
 0x1f0   : > { %p1021_p6 = por %p1020_p1, %p1019_p9 }
 0x1f2   : > { %p1022_p8 = pnand %p1021_p6, %p1015_p4 }
 0x1f4   : > { %1025 = shalt.err (!%p1022_p8)
}
 0x1f5   : > { %755 = dma.vmem_to_hbm [thread:$0]  (%p1743_p13), %s1590_s20, 128, %s494_s28, %s481_s18  }
 0x1f6 PF: > { %p772_p0 = scmp.ge.s32.totalorder %s1164_s30, 2  ;;  %s508_s24 = sand.u32 1, %s1104_s15  }
 0x1f7   : > { %p1744_p2 = scmp.ne.s32.totalorder %s1722_s25, 0  ;;  %s509_s11 = scalar_lea.sflag [#allocation5], %s508_s24 }
 0x1f9   : > { %p768_p12 = pnand %p772_p0, %p1744_p2 }
 0x1fb   : > { %1099 = dma.done.wait (!%p768_p12), %s509_s11, 128  }
 0x1fc   : > { %1101 = vsyncadd (!%p768_p12), %s509_s11, 4294967168  ;;  %s23_s30 = sadd.s32 1, %s1164_s30   ;;  %s1746_s18 = sld [smem:[#allocation13_spill]] }
 0x1fd   : > { %p1618_p10 = scmp.ge.s32.totalorder %s23_s30, 14   ;;  %s1747_s9 = sld [smem:[#allocation14_spill]] }
 0x1fe   : > { %s1748_s20 = sld [smem:[#allocation24_spill]]  ;;  %s1749_s5 = sld [smem:[#allocation15_spill]] }
 0x1ff   : > { %s1750_s23 = sld [smem:[#allocation25_spill]]  ;;  %s1751_s25 = sld [smem:[#allocation19_spill]] }
 0x200   : > { %s1752_s13 = sld [smem:[#allocation20_spill]]  ;;  %s1753_s28 = sld [smem:[#allocation21_spill]] }
 0x201   : > { %s1754_s6 = sld [smem:[#allocation23_spill]]  ;;  %s1755_s15 = smov %s1108_s16 }
 0x202   : > { %s1756_s16 = smov %s1112_s17  ;;  %s1757_s17 = smov %s1416_s19 }
 0x203   : > { %s1758_s19 = smov %s1747_s9  ;;  %s1759_s21 = smov %s1132_s22 }
 0x204   : > { %s1760_s22 = smov %s1749_s5  ;;  %s1761_s24 = smov %s1152_s27 }
 0x205   : > { %s1762_s26 = smov %s1160_s29  ;;  %22 = sbr.rel (!%p1618_p10) target bundleno = 17 (0x11), region = 116 }
 0x206   : > { %s1763_s27 = smov %s1752_s13 }
 0x207   : > { %s1764_s29 = smov %s1754_s6 }
 0x20c   :  { %514 = vsyncpa [#allocation4], 1 }
 0x20d   :  { %516 = vsyncpa [#allocation4 + $0x1], 1 }
 0x20e   :  { %517 = vsyncpa [#allocation7], 1 }
 0x20f   :  { %519 = vsyncpa [#allocation7 + $0x1], 1 }
 0x210   :  { %520 = vsyncpa [#allocation5], 1 }
 0x211   :  { %522 = vsyncpa [#allocation5 + $0x1], 1 }

</bundles_post_ra>
